<compile_context>
chip_gen: v7x
topology: tpu7x:2x2x1
jax: 0.10.0
libtpu: 0.0.40
codegen_flags: <defaults>
</compile_context>

<pallas_src>
import jax
import jax.numpy as jnp
from jax.experimental import pallas as pl
from jax.experimental.pallas import tpu as pltpu

ENC_DIMS = [19, 16, 12, 8, 4]   # encoder: 3x (Linear+Tanh), then Linear
DEC_DIMS = [4, 8, 12, 16, 19]   # decoder: 3x (Linear+Tanh), then Linear + Sigmoid


def _round_up(x, m):
    return (x + m - 1) // m * m


def _autoencoder_kernel(x_ref, *refs):
    """Transposed layout: activations are (features, BM), batch on lanes.

    refs = (w0, b0, ..., w7, b7, enc_ref, dec_ref)
    weights are (out, in) in the I/O dtype; biases are (out, 1) float32.
    """
    enc_ref, dec_ref = refs[-2], refs[-1]
    p = refs[:-2]
    cdt = x_ref.dtype  # matmul-input dtype (f32 or bf16); MXU accumulates in f32

    def linear(k, act):
        # (out, in) @ (in, BM) -> (out, BM), f32 accumulation, f32 bias add.
        return (jnp.dot(p[2 * k][...], act, preferred_element_type=jnp.float32)
                + p[2 * k + 1][...])

    act = x_ref[...]
    # ---- encoder ----
    for k in range(3):
        act = jnp.tanh(linear(k, act)).astype(cdt)
    encoded = linear(3, act)                              # (4, BM) f32
    enc_ref[...] = encoded.astype(enc_ref.dtype)

    # ---- decoder ----
    act = encoded.astype(cdt)
    for k in range(4, 7):
        act = jnp.tanh(linear(k, act)).astype(cdt)
    logits = linear(7, act)                               # (19, BM) f32
    # sigmoid(x) == 0.5*(tanh(x/2)+1): tanh runs on the EUP slot (no VALU divide)
    decoded = 0.5 * (jnp.tanh(0.5 * logits) + 1.0)
    dec_ref[...] = decoded.astype(dec_ref.dtype)


def autoencoder_forward(x, params, *, block_b=2048, io_dtype=jnp.float32):
    """x: (B, 19) float32. params: list of 8 (w, b) pairs in PyTorch layout
    (w: (out, in), b: (out,)). Returns (encoded (B, 4), decoded (B, 19)) in io_dtype."""
    B, f_in = x.shape
    assert f_in == ENC_DIMS[0]
    f_enc = ENC_DIMS[-1]

    # Batch tile on the lane axis: multiple of 128, VMEM is never the constraint here.
    bm = min(_round_up(block_b, 128), _round_up(B, 128))
    bp = _round_up(B, bm)
    grid = (bp // bm,)

    # batch-on-lanes layout: zero-pad batch to bp, transpose to (19, bp)
    xt = jnp.zeros((f_in, bp), io_dtype).at[:, :B].set(x.T.astype(io_dtype))

    flat = []
    for (w, b) in params:
        flat.append(w.astype(io_dtype))                      # (out, in)
        flat.append(b.reshape(-1, 1).astype(jnp.float32))    # (out, 1), bias add in f32

    def const_spec(a):
        # constant block index -> params stay resident in VMEM across all grid steps
        nd = a.ndim
        return pl.BlockSpec(a.shape, lambda i, nd=nd: (0,) * nd)

    in_specs = [pl.BlockSpec((f_in, bm), lambda i: (0, i))] + [const_spec(a) for a in flat]
    out_shape = (jax.ShapeDtypeStruct((f_enc, bp), io_dtype),
                 jax.ShapeDtypeStruct((f_in, bp), io_dtype))
    out_specs = (pl.BlockSpec((f_enc, bm), lambda i: (0, i)),
                 pl.BlockSpec((f_in, bm), lambda i: (0, i)))

    enc_t, dec_t = pl.pallas_call(
        _autoencoder_kernel,
        out_shape=out_shape,
        grid=grid,
        in_specs=in_specs,
        out_specs=out_specs,
        compiler_params=pltpu.CompilerParams(
            dimension_semantics=("parallel",)),   # megacore sharding on v7x
    )(xt, *flat)

    encoded = enc_t[:, :B].T
    decoded = dec_t[:, :B].T
    return encoded, decoded


def init_params(key):
    """Deterministic init mimicking nn.Linear's U(-1/sqrt(fan_in), 1/sqrt(fan_in)).
    PyTorch layout: w (out, in), b (out,)."""
    dims = list(zip(ENC_DIMS[:-1], ENC_DIMS[1:])) + list(zip(DEC_DIMS[:-1], DEC_DIMS[1:]))
    params = []
    for fan_in, fan_out in dims:
        key, kw, kb = jax.random.split(key, 3)
        bound = 1.0 / (fan_in ** 0.5)
        w = jax.random.uniform(kw, (fan_out, fan_in), jnp.float32, -bound, bound)
        b = jax.random.uniform(kb, (fan_out,), jnp.float32, -bound, bound)
        params.append((w, b))
    return params


def reference_forward(x, params):
    """Plain-JAX f32 reference for correctness check."""
    h = x
    encoded = None
    for k, (w, b) in enumerate(params):
        h = h @ w.T + b
        if k in (0, 1, 2, 4, 5, 6):
            h = jnp.tanh(h)
        if k == 3:
            encoded = h
    decoded = jax.nn.sigmoid(h)
    return encoded, decoded


if __name__ == "__main__":
    key = jax.random.PRNGKey(0)
    params = init_params(key)
    kx = jax.random.fold_in(key, 17)

    B = 8
    x = jax.random.uniform(kx, (B, ENC_DIMS[0]), jnp.float32)   # (8, 19)

    ref_enc, ref_dec = reference_forward(x, params)

    # f32 I/O path (exact semantics of the PyTorch module)
    enc, dec = autoencoder_forward(x, params, io_dtype=jnp.float32)
    jax.block_until_ready((enc, dec))
    assert enc.shape == (B, 4) and dec.shape == (B, 19)
    assert jnp.allclose(enc, ref_enc, atol=1e-4, rtol=1e-4)
    assert jnp.allclose(dec, ref_dec, atol=1e-4, rtol=1e-4)

    # bf16 I/O path (halves HBM traffic; kernel is bandwidth-bound at large B)
    enc16, dec16 = autoencoder_forward(x, params, io_dtype=jnp.bfloat16)
    jax.block_until_ready((enc16, dec16))
    assert jnp.allclose(enc16.astype(jnp.float32), ref_enc, atol=5e-2, rtol=5e-2)
    assert jnp.allclose(dec16.astype(jnp.float32), ref_dec, atol=5e-2, rtol=5e-2)

    print("KERNEL_OK")
</pallas_src>

<mosaic_0001>
module attributes {stable_mosaic.version = 11 : i64} {
  func.func @_autoencoder_kernel(%arg0: i32, %arg1: memref<19x128xf32, #tpu.memory_space<vmem>>, %arg2: memref<16x19xf32, #tpu.memory_space<vmem>>, %arg3: memref<16x1xf32, #tpu.memory_space<vmem>>, %arg4: memref<12x16xf32, #tpu.memory_space<vmem>>, %arg5: memref<12x1xf32, #tpu.memory_space<vmem>>, %arg6: memref<8x12xf32, #tpu.memory_space<vmem>>, %arg7: memref<8x1xf32, #tpu.memory_space<vmem>>, %arg8: memref<4x8xf32, #tpu.memory_space<vmem>>, %arg9: memref<4x1xf32, #tpu.memory_space<vmem>>, %arg10: memref<8x4xf32, #tpu.memory_space<vmem>>, %arg11: memref<8x1xf32, #tpu.memory_space<vmem>>, %arg12: memref<12x8xf32, #tpu.memory_space<vmem>>, %arg13: memref<12x1xf32, #tpu.memory_space<vmem>>, %arg14: memref<16x12xf32, #tpu.memory_space<vmem>>, %arg15: memref<16x1xf32, #tpu.memory_space<vmem>>, %arg16: memref<19x16xf32, #tpu.memory_space<vmem>>, %arg17: memref<19x1xf32, #tpu.memory_space<vmem>>, %arg18: memref<4x128xf32, #tpu.memory_space<vmem>>, %arg19: memref<19x128xf32, #tpu.memory_space<vmem>>) attributes {dimension_semantics = [#tpu.dimension_semantics<parallel>], iteration_bounds = array<i64: 1>, scalar_prefetch = 0 : i64, scratch_operands = 0 : i64, tpu.core_type = #tpu.core_type<tc>, window_params = [{transform_indices = @transform_0, window_bounds = array<i64: 19, 128>}, {pipeline_mode = #tpu.pipeline_mode<synchronous>, transform_indices = @transform_1, window_bounds = array<i64: 16, 19>}, {pipeline_mode = #tpu.pipeline_mode<synchronous>, transform_indices = @transform_2, window_bounds = array<i64: 16, 1>}, {pipeline_mode = #tpu.pipeline_mode<synchronous>, transform_indices = @transform_3, window_bounds = array<i64: 12, 16>}, {pipeline_mode = #tpu.pipeline_mode<synchronous>, transform_indices = @transform_4, window_bounds = array<i64: 12, 1>}, {pipeline_mode = #tpu.pipeline_mode<synchronous>, transform_indices = @transform_5, window_bounds = array<i64: 8, 12>}, {pipeline_mode = #tpu.pipeline_mode<synchronous>, transform_indices = @transform_6, window_bounds = array<i64: 8, 1>}, {pipeline_mode = #tpu.pipeline_mode<synchronous>, transform_indices = @transform_7, window_bounds = array<i64: 4, 8>}, {pipeline_mode = #tpu.pipeline_mode<synchronous>, transform_indices = @transform_8, window_bounds = array<i64: 4, 1>}, {pipeline_mode = #tpu.pipeline_mode<synchronous>, transform_indices = @transform_9, window_bounds = array<i64: 8, 4>}, {pipeline_mode = #tpu.pipeline_mode<synchronous>, transform_indices = @transform_10, window_bounds = array<i64: 8, 1>}, {pipeline_mode = #tpu.pipeline_mode<synchronous>, transform_indices = @transform_11, window_bounds = array<i64: 12, 8>}, {pipeline_mode = #tpu.pipeline_mode<synchronous>, transform_indices = @transform_12, window_bounds = array<i64: 12, 1>}, {pipeline_mode = #tpu.pipeline_mode<synchronous>, transform_indices = @transform_13, window_bounds = array<i64: 16, 12>}, {pipeline_mode = #tpu.pipeline_mode<synchronous>, transform_indices = @transform_14, window_bounds = array<i64: 16, 1>}, {pipeline_mode = #tpu.pipeline_mode<synchronous>, transform_indices = @transform_15, window_bounds = array<i64: 19, 16>}, {pipeline_mode = #tpu.pipeline_mode<synchronous>, transform_indices = @transform_16, window_bounds = array<i64: 19, 1>}, {transform_indices = @transform_17, window_bounds = array<i64: 4, 128>}, {transform_indices = @transform_18, window_bounds = array<i64: 19, 128>}]} {
    %c0 = arith.constant 0 : index
    %c0_0 = arith.constant 0 : index
    %0 = vector.load %arg1[%c0, %c0_0] : memref<19x128xf32, #tpu.memory_space<vmem>>, vector<19x128xf32>
    %c0_1 = arith.constant 0 : index
    %c0_2 = arith.constant 0 : index
    %1 = vector.load %arg2[%c0_1, %c0_2] : memref<16x19xf32, #tpu.memory_space<vmem>>, vector<16x19xf32>
    %cst = arith.constant dense<0.000000e+00> : vector<16x128xf32>
    %2 = tpu.matmul %1, %0, %cst {dimension_numbers = #tpu.dot_dimension_numbers<[1], [0], [0], [1], [0, 0, 1, 1], [], []>} : vector<16x19xf32>, vector<19x128xf32>, vector<16x128xf32> -> vector<16x128xf32>
    %c0_3 = arith.constant 0 : index
    %c0_4 = arith.constant 0 : index
    %3 = vector.load %arg3[%c0_3, %c0_4] : memref<16x1xf32, #tpu.memory_space<vmem>>, vector<16x1xf32>
    %4 = vector.broadcast %3 : vector<16x1xf32> to vector<16x128xf32>
    %5 = arith.addf %2, %4 : vector<16x128xf32>
    %6 = math.tanh %5 : vector<16x128xf32>
    %c0_5 = arith.constant 0 : index
    %c0_6 = arith.constant 0 : index
    %7 = vector.load %arg4[%c0_5, %c0_6] : memref<12x16xf32, #tpu.memory_space<vmem>>, vector<12x16xf32>
    %cst_7 = arith.constant dense<0.000000e+00> : vector<12x128xf32>
    %8 = tpu.matmul %7, %6, %cst_7 {dimension_numbers = #tpu.dot_dimension_numbers<[1], [0], [0], [1], [0, 0, 1, 1], [], []>} : vector<12x16xf32>, vector<16x128xf32>, vector<12x128xf32> -> vector<12x128xf32>
    %c0_8 = arith.constant 0 : index
    %c0_9 = arith.constant 0 : index
    %9 = vector.load %arg5[%c0_8, %c0_9] : memref<12x1xf32, #tpu.memory_space<vmem>>, vector<12x1xf32>
    %10 = vector.broadcast %9 : vector<12x1xf32> to vector<12x128xf32>
    %11 = arith.addf %8, %10 : vector<12x128xf32>
    %12 = math.tanh %11 : vector<12x128xf32>
    %c0_10 = arith.constant 0 : index
    %c0_11 = arith.constant 0 : index
    %13 = vector.load %arg6[%c0_10, %c0_11] : memref<8x12xf32, #tpu.memory_space<vmem>>, vector<8x12xf32>
    %cst_12 = arith.constant dense<0.000000e+00> : vector<8x128xf32>
    %14 = tpu.matmul %13, %12, %cst_12 {dimension_numbers = #tpu.dot_dimension_numbers<[1], [0], [0], [1], [0, 0, 1, 1], [], []>} : vector<8x12xf32>, vector<12x128xf32>, vector<8x128xf32> -> vector<8x128xf32>
    %c0_13 = arith.constant 0 : index
    %c0_14 = arith.constant 0 : index
    %15 = vector.load %arg7[%c0_13, %c0_14] : memref<8x1xf32, #tpu.memory_space<vmem>>, vector<8x1xf32>
    %16 = vector.broadcast %15 : vector<8x1xf32> to vector<8x128xf32>
    %17 = arith.addf %14, %16 : vector<8x128xf32>
    %18 = math.tanh %17 : vector<8x128xf32>
    %c0_15 = arith.constant 0 : index
    %c0_16 = arith.constant 0 : index
    %19 = vector.load %arg8[%c0_15, %c0_16] : memref<4x8xf32, #tpu.memory_space<vmem>>, vector<4x8xf32>
    %cst_17 = arith.constant dense<0.000000e+00> : vector<4x128xf32>
    %20 = tpu.matmul %19, %18, %cst_17 {dimension_numbers = #tpu.dot_dimension_numbers<[1], [0], [0], [1], [0, 0, 1, 1], [], []>} : vector<4x8xf32>, vector<8x128xf32>, vector<4x128xf32> -> vector<4x128xf32>
    %c0_18 = arith.constant 0 : index
    %c0_19 = arith.constant 0 : index
    %21 = vector.load %arg9[%c0_18, %c0_19] : memref<4x1xf32, #tpu.memory_space<vmem>>, vector<4x1xf32>
    %22 = vector.broadcast %21 : vector<4x1xf32> to vector<4x128xf32>
    %23 = arith.addf %20, %22 : vector<4x128xf32>
    %c0_20 = arith.constant 0 : index
    %c0_21 = arith.constant 0 : index
    %24 = vector.load %arg18[%c0_20, %c0_21] : memref<4x128xf32, #tpu.memory_space<vmem>>, vector<4x128xf32>
    tpu.vector_store %arg18[%c0_20, %c0_21], %23 {strides = array<i32>} : memref<4x128xf32, #tpu.memory_space<vmem>>, vector<4x128xf32>,
    %c0_22 = arith.constant 0 : index
    %c0_23 = arith.constant 0 : index
    %25 = vector.load %arg10[%c0_22, %c0_23] : memref<8x4xf32, #tpu.memory_space<vmem>>, vector<8x4xf32>
    %cst_24 = arith.constant dense<0.000000e+00> : vector<8x128xf32>
    %26 = tpu.matmul %25, %23, %cst_24 {dimension_numbers = #tpu.dot_dimension_numbers<[1], [0], [0], [1], [0, 0, 1, 1], [], []>} : vector<8x4xf32>, vector<4x128xf32>, vector<8x128xf32> -> vector<8x128xf32>
    %c0_25 = arith.constant 0 : index
    %c0_26 = arith.constant 0 : index
    %27 = vector.load %arg11[%c0_25, %c0_26] : memref<8x1xf32, #tpu.memory_space<vmem>>, vector<8x1xf32>
    %28 = vector.broadcast %27 : vector<8x1xf32> to vector<8x128xf32>
    %29 = arith.addf %26, %28 : vector<8x128xf32>
    %30 = math.tanh %29 : vector<8x128xf32>
    %c0_27 = arith.constant 0 : index
    %c0_28 = arith.constant 0 : index
    %31 = vector.load %arg12[%c0_27, %c0_28] : memref<12x8xf32, #tpu.memory_space<vmem>>, vector<12x8xf32>
    %cst_29 = arith.constant dense<0.000000e+00> : vector<12x128xf32>
    %32 = tpu.matmul %31, %30, %cst_29 {dimension_numbers = #tpu.dot_dimension_numbers<[1], [0], [0], [1], [0, 0, 1, 1], [], []>} : vector<12x8xf32>, vector<8x128xf32>, vector<12x128xf32> -> vector<12x128xf32>
    %c0_30 = arith.constant 0 : index
    %c0_31 = arith.constant 0 : index
    %33 = vector.load %arg13[%c0_30, %c0_31] : memref<12x1xf32, #tpu.memory_space<vmem>>, vector<12x1xf32>
    %34 = vector.broadcast %33 : vector<12x1xf32> to vector<12x128xf32>
    %35 = arith.addf %32, %34 : vector<12x128xf32>
    %36 = math.tanh %35 : vector<12x128xf32>
    %c0_32 = arith.constant 0 : index
    %c0_33 = arith.constant 0 : index
    %37 = vector.load %arg14[%c0_32, %c0_33] : memref<16x12xf32, #tpu.memory_space<vmem>>, vector<16x12xf32>
    %cst_34 = arith.constant dense<0.000000e+00> : vector<16x128xf32>
    %38 = tpu.matmul %37, %36, %cst_34 {dimension_numbers = #tpu.dot_dimension_numbers<[1], [0], [0], [1], [0, 0, 1, 1], [], []>} : vector<16x12xf32>, vector<12x128xf32>, vector<16x128xf32> -> vector<16x128xf32>
    %c0_35 = arith.constant 0 : index
    %c0_36 = arith.constant 0 : index
    %39 = vector.load %arg15[%c0_35, %c0_36] : memref<16x1xf32, #tpu.memory_space<vmem>>, vector<16x1xf32>
    %40 = vector.broadcast %39 : vector<16x1xf32> to vector<16x128xf32>
    %41 = arith.addf %38, %40 : vector<16x128xf32>
    %42 = math.tanh %41 : vector<16x128xf32>
    %c0_37 = arith.constant 0 : index
    %c0_38 = arith.constant 0 : index
    %43 = vector.load %arg16[%c0_37, %c0_38] : memref<19x16xf32, #tpu.memory_space<vmem>>, vector<19x16xf32>
    %cst_39 = arith.constant dense<0.000000e+00> : vector<19x128xf32>
    %44 = tpu.matmul %43, %42, %cst_39 {dimension_numbers = #tpu.dot_dimension_numbers<[1], [0], [0], [1], [0, 0, 1, 1], [], []>} : vector<19x16xf32>, vector<16x128xf32>, vector<19x128xf32> -> vector<19x128xf32>
    %c0_40 = arith.constant 0 : index
    %c0_41 = arith.constant 0 : index
    %45 = vector.load %arg17[%c0_40, %c0_41] : memref<19x1xf32, #tpu.memory_space<vmem>>, vector<19x1xf32>
    %46 = vector.broadcast %45 : vector<19x1xf32> to vector<19x128xf32>
    %47 = arith.addf %44, %46 : vector<19x128xf32>
    %cst_42 = arith.constant 5.000000e-01 : f32
    %48 = vector.broadcast %cst_42 : f32 to vector<19x128xf32>
    %49 = arith.mulf %48, %47 : vector<19x128xf32>
    %50 = math.tanh %49 : vector<19x128xf32>
    %cst_43 = arith.constant 1.000000e+00 : f32
    %51 = vector.broadcast %cst_43 : f32 to vector<19x128xf32>
    %52 = arith.addf %50, %51 : vector<19x128xf32>
    %cst_44 = arith.constant 5.000000e-01 : f32
    %53 = vector.broadcast %cst_44 : f32 to vector<19x128xf32>
    %54 = arith.mulf %53, %52 : vector<19x128xf32>
    %c0_45 = arith.constant 0 : index
    %c0_46 = arith.constant 0 : index
    %55 = vector.load %arg19[%c0_45, %c0_46] : memref<19x128xf32, #tpu.memory_space<vmem>>, vector<19x128xf32>
    tpu.vector_store %arg19[%c0_45, %c0_46], %54 {strides = array<i32>} : memref<19x128xf32, #tpu.memory_space<vmem>>, vector<19x128xf32>,
    return
  }
  func.func @transform_0(%arg0: i32) -> (i32, i32) {
    %c0_i32 = arith.constant 0 : i32
    %c0_i32_0 = arith.constant 0 : i32
    return %c0_i32, %arg0 : i32, i32
  }
  func.func @transform_1(%arg0: i32) -> (i32, i32) {
    %c0_i32 = arith.constant 0 : i32
    %c0_i32_0 = arith.constant 0 : i32
    %c0_i32_1 = arith.constant 0 : i32
    return %c0_i32, %c0_i32_0 : i32, i32
  }
  func.func @transform_2(%arg0: i32) -> (i32, i32) {
    %c0_i32 = arith.constant 0 : i32
    %c0_i32_0 = arith.constant 0 : i32
    %c0_i32_1 = arith.constant 0 : i32
    return %c0_i32, %c0_i32_0 : i32, i32
  }
  func.func @transform_3(%arg0: i32) -> (i32, i32) {
    %c0_i32 = arith.constant 0 : i32
    %c0_i32_0 = arith.constant 0 : i32
    %c0_i32_1 = arith.constant 0 : i32
    return %c0_i32, %c0_i32_0 : i32, i32
  }
  func.func @transform_4(%arg0: i32) -> (i32, i32) {
    %c0_i32 = arith.constant 0 : i32
    %c0_i32_0 = arith.constant 0 : i32
    %c0_i32_1 = arith.constant 0 : i32
    return %c0_i32, %c0_i32_0 : i32, i32
  }
  func.func @transform_5(%arg0: i32) -> (i32, i32) {
    %c0_i32 = arith.constant 0 : i32
    %c0_i32_0 = arith.constant 0 : i32
    %c0_i32_1 = arith.constant 0 : i32
    return %c0_i32, %c0_i32_0 : i32, i32
  }
  func.func @transform_6(%arg0: i32) -> (i32, i32) {
    %c0_i32 = arith.constant 0 : i32
    %c0_i32_0 = arith.constant 0 : i32
    %c0_i32_1 = arith.constant 0 : i32
    return %c0_i32, %c0_i32_0 : i32, i32
  }
  func.func @transform_7(%arg0: i32) -> (i32, i32) {
    %c0_i32 = arith.constant 0 : i32
    %c0_i32_0 = arith.constant 0 : i32
    %c0_i32_1 = arith.constant 0 : i32
    return %c0_i32, %c0_i32_0 : i32, i32
  }
  func.func @transform_8(%arg0: i32) -> (i32, i32) {
    %c0_i32 = arith.constant 0 : i32
    %c0_i32_0 = arith.constant 0 : i32
    %c0_i32_1 = arith.constant 0 : i32
    return %c0_i32, %c0_i32_0 : i32, i32
  }
  func.func @transform_9(%arg0: i32) -> (i32, i32) {
    %c0_i32 = arith.constant 0 : i32
    %c0_i32_0 = arith.constant 0 : i32
    %c0_i32_1 = arith.constant 0 : i32
    return %c0_i32, %c0_i32_0 : i32, i32
  }
  func.func @transform_10(%arg0: i32) -> (i32, i32) {
    %c0_i32 = arith.constant 0 : i32
    %c0_i32_0 = arith.constant 0 : i32
    %c0_i32_1 = arith.constant 0 : i32
    return %c0_i32, %c0_i32_0 : i32, i32
  }
  func.func @transform_11(%arg0: i32) -> (i32, i32) {
    %c0_i32 = arith.constant 0 : i32
    %c0_i32_0 = arith.constant 0 : i32
    %c0_i32_1 = arith.constant 0 : i32
    return %c0_i32, %c0_i32_0 : i32, i32
  }
  func.func @transform_12(%arg0: i32) -> (i32, i32) {
    %c0_i32 = arith.constant 0 : i32
    %c0_i32_0 = arith.constant 0 : i32
    %c0_i32_1 = arith.constant 0 : i32
    return %c0_i32, %c0_i32_0 : i32, i32
  }
  func.func @transform_13(%arg0: i32) -> (i32, i32) {
    %c0_i32 = arith.constant 0 : i32
    %c0_i32_0 = arith.constant 0 : i32
    %c0_i32_1 = arith.constant 0 : i32
    return %c0_i32, %c0_i32_0 : i32, i32
  }
  func.func @transform_14(%arg0: i32) -> (i32, i32) {
    %c0_i32 = arith.constant 0 : i32
    %c0_i32_0 = arith.constant 0 : i32
    %c0_i32_1 = arith.constant 0 : i32
    return %c0_i32, %c0_i32_0 : i32, i32
  }
  func.func @transform_15(%arg0: i32) -> (i32, i32) {
    %c0_i32 = arith.constant 0 : i32
    %c0_i32_0 = arith.constant 0 : i32
    %c0_i32_1 = arith.constant 0 : i32
    return %c0_i32, %c0_i32_0 : i32, i32
  }
  func.func @transform_16(%arg0: i32) -> (i32, i32) {
    %c0_i32 = arith.constant 0 : i32
    %c0_i32_0 = arith.constant 0 : i32
    %c0_i32_1 = arith.constant 0 : i32
    return %c0_i32, %c0_i32_0 : i32, i32
  }
  func.func @transform_17(%arg0: i32) -> (i32, i32) {
    %c0_i32 = arith.constant 0 : i32
    %c0_i32_0 = arith.constant 0 : i32
    return %c0_i32, %arg0 : i32, i32
  }
  func.func @transform_18(%arg0: i32) -> (i32, i32) {
    %c0_i32 = arith.constant 0 : i32
    %c0_i32_0 = arith.constant 0 : i32
    return %c0_i32, %arg0 : i32, i32
  }
}

</mosaic_0001>

<bundles_post_ra>
// kernel: tpu_custom_call.1
= control target key start
LH: loop header
LB: loop body
LE: loop exit
PB: predicated region body
PF: predicated region fallthrough
CT: control target
= control target key end

     0   :  { %s1338_s0 = inlined_call_operand.vmem [shape: f32[19,128], index: 0, kind: input, shape index: {}]   ;;  %s1339_s1 = inlined_call_operand.vmem [shape: f32[16,19], index: 1, kind: input, shape index: {}]   ;;  %s1340_s2 = inlined_call_operand.vmem [shape: f32[16,1], index: 2, kind: input, shape index: {}]   ;;  %s1341_s3 = inlined_call_operand.vmem [shape: f32[12,16], index: 3, kind: input, shape index: {}]   ;;  %s1342_s4 = inlined_call_operand.vmem [shape: f32[12,1], index: 4, kind: input, shape index: {}]   ;;  %s1343_s5 = inlined_call_operand.vmem [shape: f32[8,12], index: 5, kind: input, shape index: {}]   ;;  %s1344_s6 = inlined_call_operand.vmem [shape: f32[8,1], index: 6, kind: input, shape index: {}]   ;;  %s1345_s7 = inlined_call_operand.vmem [shape: f32[4,8], index: 7, kind: input, shape index: {}]   ;;  %s1346_s8 = inlined_call_operand.vmem [shape: f32[4,1], index: 8, kind: input, shape index: {}]   ;;  %s1347_s9 = inlined_call_operand.vmem [shape: f32[8,4], index: 9, kind: input, shape index: {}]   ;;  %s1348_s10 = inlined_call_operand.vmem [shape: f32[8,1], index: 10, kind: input, shape index: {}]   ;;  %s1349_s11 = inlined_call_operand.vmem [shape: f32[12,8], index: 11, kind: input, shape index: {}]   ;;  %s1350_s12 = inlined_call_operand.vmem [shape: f32[12,1], index: 12, kind: input, shape index: {}]   ;;  %s1351_s13 = inlined_call_operand.vmem [shape: f32[16,12], index: 13, kind: input, shape index: {}]   ;;  %s1352_s14 = inlined_call_operand.vmem [shape: f32[16,1], index: 14, kind: input, shape index: {}]   ;;  %s1353_s15 = inlined_call_operand.vmem [shape: f32[19,16], index: 15, kind: input, shape index: {}]   ;;  %s1354_s16 = inlined_call_operand.vmem [shape: f32[19,1], index: 16, kind: input, shape index: {}]   ;;  %s1355_s17 = inlined_call_operand.hbm [shape: f32[4,128], index: 17, kind: output, shape index: {0}]   ;;  %s1356_s18 = inlined_call_operand.hbm [shape: f32[19,128], index: 18, kind: output, shape index: {1}]  }
   0x1   :  { %1360 = sst [smem:[#allocation8_spill]] %s1338_s0 }
   0x2   :  { %1361 = sst [smem:[#allocation9_spill]] %s1339_s1 }
   0x3   :  { %1362 = sst [smem:[#allocation10_spill]] %s1340_s2 }
   0x4   :  { %24 = vsyncpa [#allocation3], 0  ;;  %s1363_s29 = sld [smem:[#allocation8_spill]]  ;;  %vm77_vm0 = vcmask 154624   ;;  %s1364_s20 = sld [smem:[#allocation9_spill]]  ;;  %vm84_vm1 = vcmask 1042432  }
   0x5   :  { %s1365_s2 = sld [smem:[#allocation10_spill]]  ;;  %v1078_v6 = vmov 0  }
   0x6   :  { %1002 = vset.pattern.permute.xlu0 %v1078_v6  ;;  %1003 = vset.pattern.permute.xlu1 %v1078_v6 }
   0xa   :  { %v60_v0 = vld [vmem:[%s1363_s29] sm:$0xff]  ;;  %v61_v1 = vld [vmem:[%s1363_s29 + $0x8] sm:$0xff]  ;;  %v62_v5 = vld [vmem:[%s1363_s29 + $0x10] sm:$0x7] }
   0xb   :  { %v972_v2 = vpack.c.bf16 %v61_v1, %v60_v0  ;;  %v63_v3 = vld [vmem:[%s1364_s20] sm:$0xff]  ;;  %v66_v7 = vld [vmem:[%s1365_s2 + $0x8] sm:$0xff] }
   0xc   :  { %v65_v4 = vld [vmem:[%s1365_s2] sm:$0xff]  ;;  %920 = vmatprep.mubr.msk.f32.mxu1 %vm77_vm0, %v63_v3 }
   0xd   :  { %973 = vmatprep.subr.bf16.mxu1 %v972_v2  ;;  %69 = vperm.xlu0 %1002, %v65_v4  }
   0xe   :  { %975 = vmatpush3.bf16.msra.mxu1 %v972_v2 }
   0xf   :  { %25 = vsyncpa [#allocation5], 0  ;;  %918 = vmatprep.subr.msk.mxu1 %vm84_vm1, %v62_v5  ;;  %v64_v8 = vld [vmem:[%s1364_s20 + $0x8] sm:$0xff]  ;;  %v264_v9 = vld [vmem:[%s1344_s6] sm:$0xff]  ;;  %vm179_vm2 = vcmask 130048   ;;  %v1079_v32 = vmov 0.0|0.0  }
  0x10   :  { %v432_v10 = vld [vmem:[%s1348_s10] sm:$0xff]  ;;  %v519_v11 = vld [vmem:[%s1350_s12 + $0x8] sm:$0xf]  ;;  %v718_v21 = vld [vmem:[%s1354_s16 + $0x10] sm:$0x7]  ;;  %vm1080_vm3 = vmmov 0  }
  0x11   :  { %74 = vperm.xlu0 %1002, %v66_v7   ;;  %v616_v12 = vld [vmem:[%s1352_s14 + $0x8] sm:$0xff]  ;;  %v165_v14 = vld [vmem:[%s1341_s3] sm:$0xff]  ;;  %v1081_v33 = vmov 0.0   ;;  %vm274_vm4 = vcmask 1043456   ;;  %vm1082_vm5 = vmmov 1   ;;  %vm270_vm7 = vcmask 97280  }
  0x12   :  { %919 = vmatpush3.msk.msra.mxu1 %vm84_vm1, %v62_v5  ;;  %v717_v13 = vld [vmem:[%s1354_s16 + $0x8] sm:$0xff]  ;;  %v167_v15 = vld [vmem:[%s1342_s4] sm:$0xff]  ;;  %937 = vmatprep.subr.mxu0 %v1081_v33  ;;  %vm1255_vm6 = vmpackc.low %vm274_vm4, %vm1082_vm5  ;;  %vm356_vm8 = vcmask 64512   ;;  %vm438_vm9 = vcmask 31744   ;;  %s1083_s19 = smov [#allocation2]  }
  0x13   :  { %921 = vmatmul.mubr.msk.f32.vlgmr.msra.gmra.mrb[0].mxu1 %vm77_vm0, %v64_v8  ;;  %171 = vperm.xlu1 %1003, %v167_v15   ;;  %v168_v16 = vld [vmem:[%s1342_s4 + $0x8] sm:$0xf]  ;;  %v350_v17 = vld [vmem:[%s1346_s8] sm:$0xf]  ;;  %s844_s1 = sshll.u32 %s1083_s19, 4  ;;  %s845_s1 = int_to_ptr.vmem [resolvable:$true] %s844_s1 }
  0x14   :  { %927 = vmatprep.mubr.msk.f32.mxu1 %vm179_vm2, %v165_v14  ;;  %v518_v18 = vld [vmem:[%s1350_s12] sm:$0xff]  ;;  %v166_v31 = vld [vmem:[%s1341_s3 + $0x8] sm:$0xf]  ;;  %939 = vmatprep.mubr.msk.f32.mxu0 %vm1080_vm3, %v1081_v33  ;;  %s1030_s21 = scalar_lea.vmem %s845_s1, 64  ;;  %p1035_p1 = scmp.lt.s32.totalorder %s845_s1, %s845_s1 }
  0x15   :  { %267 = vperm.xlu0 %1002, %v264_v9   ;;  %v615_v19 = vld [vmem:[%s1352_s14] sm:$0xff]  ;;  %v517_v62 = vld [vmem:[%s1349_s11 + $0x8] sm:$0xf]  ;;  %p1031_p0 = scmp.ne.s32.totalorder %s845_s1, %s1030_s21  ;;  %p1036_p2 = scmp.lt.s32.totalorder %s1030_s21, %s1030_s21 }
  0x16   :  { %v716_v20 = vld [vmem:[%s1354_s16] sm:$0xff]  ;;  %v614_v9 = vld [vmem:[%s1351_s13 + $0x8] sm:$0xff] }
  0x17   :  { %176 = vperm.xlu1 %1003, %v168_v16   ;;  %v263_v44 = vld [vmem:[%s1343_s5] sm:$0xff]  ;;  %p1037_p3 = por %p1036_p2, %p1035_p1 }
  0x18   :  { %v349_v49 = vld [vmem:[%s1345_s7] sm:$0xf] }
  0x19   :  { %435 = vperm.xlu0 %1002, %v432_v10   ;;  %v431_v55 = vld [vmem:[%s1347_s9] sm:$0xff]  ;;  %p1038_p4 = pnand %p1037_p3, %p1031_p0 }
  0x1a   :  { %v516_v56 = vld [vmem:[%s1349_s11] sm:$0xff] }
  0x1b   :  { %353 = vperm.xlu1 %1003, %v350_v17   ;;  %v613_v63 = vld [vmem:[%s1351_s13] sm:$0xff] }
  0x1d   :  { %527 = vperm.xlu0 %1002, %v519_v11  }
  0x1f   :  { %522 = vperm.xlu1 %1003, %v518_v18  }
  0x21   :  { %624 = vperm.xlu0 %1002, %v616_v12  }
  0x23   :  { %619 = vperm.xlu1 %1003, %v615_v19   ;;  %v713_v19 = vld [vmem:[%s1353_s15] sm:$0xff] }
  0x25   :  { %726 = vperm.xlu0 %1002, %v717_v13  }
  0x27   :  { %721 = vperm.xlu1 %1003, %v716_v20   ;;  %v714_v20 = vld [vmem:[%s1353_s15 + $0x8] sm:$0xff] }
  0x2b   :  { %731 = vperm.xlu1 %1003, %v718_v21   ;;  %v715_v21 = vld [vmem:[%s1353_s15 + $0x10] sm:$0x7] }
  0x8c   :  { %v70_v22 = vpop.permute.xlu0 %69 }
  0x90   :  { %v75_v23 = vpop.permute.xlu0 %74 }
  0x92   :  { %v172_v34 = vpop.permute.xlu1 %171 }
  0x94   :  { %v268_v45 = vpop.permute.xlu0 %267 }
  0x96   :  { %v177_v35 = vpop.permute.xlu1 %176 }
  0x98   :  { %v436_v57 = vpop.permute.xlu0 %435 }
  0x9a   :  { %v354_v51 = vpop.permute.xlu1 %353 }
  0x9c   :  { %v528_v0 = vpop.permute.xlu0 %527 }
  0x9e   :  { %v523_v2 = vpop.permute.xlu1 %522 }
  0xa0   :  { %v625_v10 = vpop.permute.xlu0 %624 }
  0xa2   :  { %v620_v12 = vpop.permute.xlu1 %619 }
  0xe6   :  { %v922_v24 = vpop.f32.mrb[0].mxu1 }
  0xe7   :  { %v160_v25 = vadd.f32 %v922_v24, %v75_v23  ;;  %v154_v26 = vpop.f32.mrb[1].mxu1 }
  0xe8   :  { %v155_v27 = vadd.f32 %v154_v26, %v70_v22 }
  0xe9   :  { %1004 = vtanh.f32 %v160_v25 }
  0xea   :  { %1006 = vtanh.f32 %v155_v27 }
  0xf3   :  { %v1005_v28 = vpop.eup %1004 }
  0xf4   :  { %v1007_v29 = vpop.eup %1006 }
  0xf5   :  { %v976_v30 = vpack.c.bf16 %v1005_v28, %v1007_v29 }
  0xf7   :  { %977 = vmatprep.subr.bf16.mxu1 %v976_v30 }
  0xf8   :  { %979 = vmatpush3.bf16.msra.mxu1 %v976_v30 }
  0xf9   :  { %980 = vmatprep.subr.bf16.mxu1 %v1079_v32 }
  0xfb   :  { %928 = vmatmul.mubr.msk.f32.vlgmr.msra.gmra.mrb[2].mxu1 %vm179_vm2, %v166_v31 }
  0xfc   :  { %934 = vmatprep.mubr.msk.f32.mxu1 %vm1080_vm3, %v1081_v33 }
 0x1ce   :  { %v929_v36 = vpop.f32.mrb[2].mxu1 }
 0x1cf   :  { %v258_v37 = vadd.f32 %v929_v36, %v177_v35  ;;  %v252_v38 = vpop.f32.mrb[3].mxu1 }
 0x1d0   :  { %v253_v39 = vadd.f32 %v252_v38, %v172_v34 }
 0x1d1   :  { %1008 = vtanh.f32 %v258_v37 }
 0x1d2   :  { %1010 = vtanh.f32 %v253_v39 }
 0x1db   :  { %v1009_v40 = vpop.eup %1008 }
 0x1dc   :  { %v1011_v41 = vpop.eup %1010 }
 0x1dd   :  { %v981_v43 = vpack.c.bf16 %v1009_v40, %v1011_v41 }
 0x1df   :  { %983 = vmatpush3.bf16.msk.msra.mxu1 %vm1255_vm6, %v981_v43 }
 0x1e0   :  { %942 = vmatprep.subr.mxu1 %v1081_v33 }
 0x1e2   :  { %935 = vmatmul.mubr.msk.f32.vlgmr.msra.gmra.mrb[4].mxu1 %vm270_vm7, %v263_v44 }
 0x1e3   :  { %944 = vmatprep.mubr.msk.f32.mxu1 %vm1080_vm3, %v1081_v33 }
 0x2b5   :  { %v344_v46 = vpop.f32.mrb[4].mxu1 }
 0x2b6   :  { %v345_v47 = vadd.f32 %v344_v46, %v268_v45  ;;  %v936_v48 = vpop.f32.mrb[5].mxu1 }
 0x2b8   :  { %1012 = vtanh.f32 %v345_v47 }
 0x2c2   :  { %v1013_v50 = vpop.eup %1012 }
 0x2c3   :  { %938 = vmatpush3.msra.mxu0 %v1013_v50 }
 0x2c4   :  { %940 = vmatmul.mubr.msk.f32.vlgmr.msra.gmra.mrb[0].mxu0 %vm356_vm8, %v349_v49 }
 0x2c5   :  { %949 = vmatprep.mubr.msk.f32.mxu0 %vm356_vm8, %v516_v56 }
 0x397   :  { %v426_v52 = vpop.f32.mrb[0].mxu0 }
 0x398   :  { %v427_v53 = vadd.f32 %v426_v52, %v354_v51  ;;  %v941_v54 = vpop.f32.mrb[1].mxu0 }
 0x39a   :  { %430 = vst [vmem:[#allocation2] sm:$0xf] %v427_v53  ;;  %943 = vmatpush3.msk.msra.mxu1 %vm274_vm4, %v427_v53 }
 0x39b   :  { %945 = vmatmul.mubr.msk.f32.vlgmr.msra.gmra.mrb[6].mxu1 %vm438_vm9, %v431_v55 }
 0x39c   :  { %956 = vmatprep.mubr.msk.f32.mxu1 %vm270_vm7, %v613_v63 }
 0x46e   :  { %v511_v58 = vpop.f32.mrb[6].mxu1 }
 0x46f   :  { %v512_v59 = vadd.f32 %v511_v58, %v436_v57  ;;  %v946_v60 = vpop.f32.mrb[7].mxu1 }
 0x471   :  { %1014 = vtanh.f32 %v512_v59 }
 0x47b   :  { %v1015_v61 = vpop.eup %1014 }
 0x47c   :  { %947 = vmatprep.subr.mxu0 %v1015_v61 }
 0x47d   :  { %948 = vmatpush3.msra.mxu0 %v1015_v61 }
 0x47e   :  { %950 = vmatmul.mubr.msk.f32.vlgmr.msra.gmra.mrb[2].mxu0 %vm356_vm8, %v517_v62  ;;  %990 = vmatprep.subr.bf16.mxu0 %v1079_v32 }
 0x47f   :  { %963 = vmatprep.mubr.msk.f32.mxu0 %vm1080_vm3, %v1081_v33 }
 0x551   :  { %v951_v1 = vpop.f32.mrb[2].mxu0 }
 0x552   :  { %v608_v3 = vadd.f32 %v951_v1, %v528_v0  ;;  %v602_v4 = vpop.f32.mrb[3].mxu0 }
 0x553   :  { %v603_v5 = vadd.f32 %v602_v4, %v523_v2 }
 0x554   :  { %1016 = vtanh.f32 %v608_v3 }
 0x555   :  { %1018 = vtanh.f32 %v603_v5 }
 0x55e   :  { %v1017_v6 = vpop.eup %1016 }
 0x55f   :  { %v1019_v7 = vpop.eup %1018 }
 0x560   :  { %v984_v8 = vpack.c.bf16 %v1017_v6, %v1019_v7 }
 0x562   :  { %986 = vmatprep.subr.msk.bf16.mxu1 %vm1255_vm6, %v984_v8 }
 0x563   :  { %989 = vmatpush3.bf16.msk.msra.mxu1 %vm1255_vm6, %v984_v8 }
 0x566   :  { %957 = vmatmul.mubr.msk.f32.vlgmr.msra.gmra.mrb[8].mxu1 %vm270_vm7, %v614_v9 }
 0x639   :  { %v958_v11 = vpop.f32.mrb[8].mxu1 }
 0x63a   :  { %v708_v13 = vadd.f32 %v958_v11, %v625_v10  ;;  %v702_v14 = vpop.f32.mrb[9].mxu1 }
 0x63b   :  { %v703_v15 = vadd.f32 %v702_v14, %v620_v12 }
 0x63c   :  { %1020 = vtanh.f32 %v708_v13 }
 0x63d   :  { %1022 = vtanh.f32 %v703_v15 }
 0x646   :  { %v1021_v16 = vpop.eup %1020 }
 0x647   :  { %v1023_v17 = vpop.eup %1022 }
 0x648   :  { %v991_v18 = vpack.c.bf16 %v1021_v16, %v1023_v17 }
 0x64a   :  { %992 = vmatpush3.bf16.msra.mxu0 %v991_v18 }
 0x64d   :  { %964 = vmatmul.mubr.msk.f32.vlgmr.msra.gmra.mrb[4].mxu0 %vm179_vm2, %v713_v19 }
 0x64e   :  { %966 = vmatprep.mubr.msk.f32.mxu0 %vm1080_vm3, %v1081_v33 }
 0x651   :  { %967 = vmatmul.mubr.msk.f32.gmra.mrb[6].mxu0 %vm179_vm2, %v714_v20 }
 0x652   :  { %969 = vmatprep.mubr.msk.f32.mxu0 %vm1080_vm3, %v1081_v33 }
 0x655   :  { %970 = vmatmul.mubr.msk.f32.gmra.mrb[8].mxu0 %vm179_vm2, %v715_v21 }
 0x656   :  { %1041 = shalt.err (!%p1038_p4)
}
 0x657   :  { %s1042_s22 = scalar_lea.hbm %s1355_s17, 64 }
 0x658   :  { %p1043_p5 = scmp.ne.s32.totalorder %s1355_s17, %s1042_s22  ;;  %p1046_p6 = scmp.lt.u32.totalorder %s1042_s22, %s1355_s17 }
 0x65a   :  { %p1048_p7 = pnand %p1046_p6, %p1043_p5 }
 0x65c   :  { %1051 = shalt.err (!%p1048_p7)
}
 0x65d   :  { %847 = dma.vmem_to_hbm [thread:$0]  %s845_s1, 64, %s1355_s17, [#allocation3]   ;;  %v722_v22 = vpop.permute.xlu1 %721  ;;  %v727_v27 = vpop.permute.xlu0 %726 }
 0x65e   :  { %s1084_s17 = smov [#allocation4]  }
 0x65f   :  { %s853_s2 = sshll.u32 %s1084_s17, 4  ;;  %s854_s2 = int_to_ptr.vmem [resolvable:$true] %s853_s2 }
 0x660   :  { %s1052_s5 = scalar_lea.vmem %s854_s2, 384  ;;  %p1057_p9 = scmp.lt.s32.totalorder %s854_s2, %s854_s2 }
 0x661   :  { %v732_v32 = vpop.permute.xlu1 %731  ;;  %p1053_p8 = scmp.ne.s32.totalorder %s854_s2, %s1052_s5  ;;  %p1058_p10 = scmp.lt.s32.totalorder %s1052_s5, %s1052_s5 }
 0x663   :  { %p1059_p11 = por %p1058_p10, %p1057_p9 }
 0x665   :  { %p1060_p12 = pnand %p1059_p11, %p1053_p8 }
 0x720   :  { %v809_v23 = vpop.f32.mrb[4].mxu0 }
 0x721   :  { %v810_v24 = vadd.f32 %v809_v23, %v722_v22  ;;  %v965_v25 = vpop.f32.mrb[5].mxu0 }
 0x723   :  { %v823_v26 = vmul.f32 0.5, %v810_v24 }
 0x724   :  { %v814_v28 = vpop.f32.mrb[6].mxu0 }
 0x725   :  { %1024 = vtanh.f32 %v823_v26  ;;  %v815_v29 = vadd.f32 %v814_v28, %v727_v27  ;;  %v968_v30 = vpop.f32.mrb[7].mxu0 }
 0x727   :  { %v824_v31 = vmul.f32 0.5, %v815_v29 }
 0x728   :  { %v819_v33 = vpop.f32.mrb[8].mxu0 }
 0x729   :  { %1026 = vtanh.f32 %v824_v31  ;;  %v820_v34 = vadd.f32 %v819_v33, %v732_v32  ;;  %v971_v35 = vpop.f32.mrb[9].mxu0 }
 0x72b   :  { %v825_v36 = vmul.f32 0.5, %v820_v34 }
 0x72d   :  { %1028 = vtanh.f32 %v825_v36 }
 0x72f   :  { %v1025_v37 = vpop.eup %1024 }
 0x730   :  { %v829_v38 = vadd.f32 1.0, %v1025_v37 }
 0x732   :  { %v832_v39 = vmul.f32 0.5, %v829_v38 }
 0x733   :  { %v1027_v40 = vpop.eup %1026 }
 0x734   :  { %835 = vst [vmem:[#allocation4] sm:$0xff] %v832_v39  ;;  %v830_v41 = vadd.f32 1.0, %v1027_v40 }
 0x736   :  { %v833_v42 = vmul.f32 0.5, %v830_v41 }
 0x737   :  { %v1029_v43 = vpop.eup %1028 }
 0x738   :  { %836 = vst [vmem:[#allocation4 + $0x8] sm:$0xff] %v833_v42  ;;  %v831_v44 = vadd.f32 1.0, %v1029_v43 }
 0x73a   :  { %v834_v45 = vmul.f32 0.5, %v831_v44 }
 0x73c   :  { %837 = vst [vmem:[#allocation4 + $0x10] sm:$0x7] %v834_v45 }
 0x73d   :  { %1063 = shalt.err (!%p1060_p12)
}
 0x73e   :  { %s1064_s7 = scalar_lea.hbm %s1356_s18, 384 }
 0x73f   :  { %p1065_p13 = scmp.ne.s32.totalorder %s1356_s18, %s1064_s7  ;;  %p1068_p0 = scmp.lt.u32.totalorder %s1064_s7, %s1356_s18 }
 0x741   :  { %p1070_p1 = pnand %p1068_p0, %p1065_p13 }
 0x743   :  { %1073 = shalt.err (!%p1070_p1)
}
 0x744   :  { %s1085_s11 = smov 128   ;;  %s1086_s26 = smov 8  }
 0x745   :  { %859 = dma.vmem_to_hbm [thread:$0]  %s854_s2, 384, %s1356_s18, [#allocation5], %s1085_s11, %s1085_s11, %s1086_s26  }
 0x746   :  { %1074 = dma.done.wait [#allocation3], 64  }
 0x747   :  { %1075 = vsyncadd [#allocation3], 4294967232 }
 0x748   :  { %1076 = dma.done.wait [#allocation5], 384  }
 0x749   :  { %1077 = vsyncadd [#allocation5], 4294966912 }
 0x74a   :  { %866 = vsyncpa [#allocation3], 1 }
 0x74b   :  { %867 = vsyncpa [#allocation5], 1 }

</bundles_post_ra>
